<compile_context>
chip_gen: v6e
topology: v6e:2x2x1
jax: 0.10.0
libtpu: 0.0.40
codegen_flags: <defaults>
</compile_context>

<pallas_src>
import functools
import math

import jax
import jax.numpy as jnp
from jax.experimental import pallas as pl
from jax.experimental.pallas import tpu as pltpu


# ----------------------------------------------------------------------------
# Kernels
# ----------------------------------------------------------------------------
def _broadcast_pos(pos_ref, batch):
    """(ts, E) positional block -> (ts, B*E), replicated along lanes."""
    pos = pos_ref[...]
    if batch == 1:
        return pos
    # Static, small concatenate along the lane axis (pos block is tiny).
    return jnp.concatenate([pos] * batch, axis=-1)


def _pe_eval_kernel(x_ref, pos_ref, o_ref, *, batch):
    """o = x + pos  (dropout is identity in eval mode)."""
    o_ref[...] = (x_ref[...] + _broadcast_pos(pos_ref, batch)).astype(o_ref.dtype)


def _pe_train_kernel(x_ref, pos_ref, bits_ref, o_ref, *, batch, keep_thresh,
                     inv_keep):
    """o = dropout(x + pos): integer-domain keep test + single fused scale."""
    val = x_ref[...] + _broadcast_pos(pos_ref, batch)
    # bits are uniform int32 in [0, 2^31); drop prob = rate  <=>  bits < thresh
    keep = bits_ref[...] >= keep_thresh
    o_ref[...] = (jnp.where(keep, val, 0.0) * inv_keep).astype(o_ref.dtype)


# ----------------------------------------------------------------------------
# Wrapper
# ----------------------------------------------------------------------------
def make_pos_embedding(emb_size, maxlen=5000, dtype=jnp.float32):
    """Deterministic buffer identical to the PyTorch __init__."""
    den = jnp.exp(-jnp.arange(0, emb_size, 2, dtype=jnp.float32)
                  * math.log(10000.0) / emb_size)                 # (E/2,)
    pos = jnp.arange(0, maxlen, dtype=jnp.float32).reshape(maxlen, 1)
    pe = jnp.zeros((maxlen, emb_size), dtype=jnp.float32)
    pe = pe.at[:, 0::2].set(jnp.sin(pos * den))
    pe = pe.at[:, 1::2].set(jnp.cos(pos * den))
    return pe[:, None, :].astype(dtype)                           # (maxlen, 1, E)


def _choose_seq_tile(n_rows, row_bytes, target_block_bytes):
    """Rows per block: multiple of 8 (sublane-dense), ~target_block_bytes big.

    With x + out + bits + pos blocks double-buffered this stays well under the
    32 MiB scoped-VMEM limit we request (and under v7x's 64 MiB physical VMEM).
    """
    ts = max(8, target_block_bytes // max(row_bytes, 1))
    ts = max(8, (ts // 8) * 8)
    return n_rows if ts >= n_rows else ts


def positional_encoding(token_embedding, pos_embedding, *, dropout_rate=0.1,
                        dropout_bits=None, seq_tile_bytes=2 * 1024 * 1024):
    """token_embedding: (S, B, E); pos_embedding: (maxlen, 1, E).

    dropout_bits: optional int32 array (S, B, E), uniform in [0, 2^31).  If
    given (and dropout_rate > 0) the training-mode dropout is applied;
    otherwise the call is eval-mode (identity dropout).
    """
    assert 0.0 <= dropout_rate < 1.0
    S, B, E = token_embedding.shape
    dtype = token_embedding.dtype
    lane = B * E

    # Free reshapes: collapse trailing dims so the output slab is lane-dense.
    x2d = token_embedding.reshape(S, lane)                        # (S, B*E)
    pos2d = pos_embedding[:S, 0, :].astype(dtype)                 # (S, E)

    itemsize = jnp.dtype(dtype).itemsize
    ts = _choose_seq_tile(S, lane * itemsize, seq_tile_bytes)
    grid = (pl.cdiv(S, ts),)

    train = (dropout_bits is not None) and dropout_rate > 0.0

    in_specs = [
        pl.BlockSpec((ts, lane), lambda i: (i, 0)),   # x
        pl.BlockSpec((ts, E), lambda i: (i, 0)),      # pos (broadcast in kernel)
    ]
    operands = [x2d, pos2d]

    if train:
        kernel = functools.partial(
            _pe_train_kernel, batch=B,
            keep_thresh=int(round(dropout_rate * (1 << 31))),
            inv_keep=float(1.0 / (1.0 - dropout_rate)))
        in_specs.append(pl.BlockSpec((ts, lane), lambda i: (i, 0)))
        operands.append(dropout_bits.reshape(S, lane).astype(jnp.int32))
        bits_bytes = S * lane * 4
    else:
        kernel = functools.partial(_pe_eval_kernel, batch=B)
        bits_bytes = 0

    cost = pl.CostEstimate(
        flops=S * lane * (3 if train else 1),
        transcendentals=0,
        bytes_accessed=2 * S * lane * itemsize + S * E * itemsize + bits_bytes)

    out2d = pl.pallas_call(
        kernel,
        out_shape=jax.ShapeDtypeStruct((S, lane), dtype),
        grid=grid,
        in_specs=in_specs,
        out_specs=pl.BlockSpec((ts, lane), lambda i: (i, 0)),
        compiler_params=pltpu.CompilerParams(
            dimension_semantics=("parallel",),        # lets v7x use both TCs
            vmem_limit_bytes=32 * 1024 * 1024),       # raises v5e's 16 MiB default
        cost_estimate=cost,
    )(*operands)

    return out2d.reshape(S, B, E)


# ----------------------------------------------------------------------------
# Demo / self-check
# ----------------------------------------------------------------------------
if __name__ == "__main__":
    SEQ, BATCH, EMB, MAXLEN = 8, 2, 32, 64
    DROPOUT = 0.1

    root = jax.random.PRNGKey(0)
    kx, kb = jax.random.split(root)
    x = jax.random.normal(kx, (SEQ, BATCH, EMB), dtype=jnp.float32)
    pos_embedding = make_pos_embedding(EMB, maxlen=MAXLEN)

    # ---- eval-mode forward (dropout is identity), matching module.eval() ----
    out = positional_encoding(x, pos_embedding, dropout_rate=DROPOUT)
    out = jax.block_until_ready(out)
    ref = x + pos_embedding[:SEQ]
    assert out.shape == (SEQ, BATCH, EMB)
    assert jnp.allclose(out, ref, atol=1e-6), "eval-mode mismatch vs reference"

    # ---- training-mode forward with caller-supplied random bits ------------
    bits = (jax.random.bits(kb, (SEQ, BATCH, EMB), dtype=jnp.uint32) >> 1)
    bits = bits.astype(jnp.int32)                                  # [0, 2^31)
    out_tr = positional_encoding(x, pos_embedding, dropout_rate=DROPOUT,
                                 dropout_bits=bits)
    out_tr = jax.block_until_ready(out_tr)

    keep = bits >= int(round(DROPOUT * (1 << 31)))
    ref_tr = jnp.where(keep, (x + pos_embedding[:SEQ]) * (1.0 / (1.0 - DROPOUT)),
                       0.0)
    assert jnp.allclose(out_tr, ref_tr, atol=1e-6), "train-mode mismatch"

    print("KERNEL_OK")
</pallas_src>

<mosaic_0001>
module attributes {stable_mosaic.version = 11 : i64} {
  func.func @_pe_eval_kernel(%arg0: i32, %arg1: memref<8x64xf32, #tpu.memory_space<vmem>>, %arg2: memref<8x32xf32, #tpu.memory_space<vmem>>, %arg3: memref<8x64xf32, #tpu.memory_space<vmem>>) attributes {dimension_semantics = [#tpu.dimension_semantics<parallel>], iteration_bounds = array<i64: 1>, scalar_prefetch = 0 : i64, scratch_operands = 0 : i64, tpu.core_type = #tpu.core_type<tc>, window_params = [{transform_indices = @transform_0, window_bounds = array<i64: 8, 64>}, {transform_indices = @transform_1, window_bounds = array<i64: 8, 32>}, {transform_indices = @transform_2, window_bounds = array<i64: 8, 64>}]} {
    %c0 = arith.constant 0 : index
    %c0_0 = arith.constant 0 : index
    %0 = vector.load %arg1[%c0, %c0_0] : memref<8x64xf32, #tpu.memory_space<vmem>>, vector<8x64xf32>
    %c0_1 = arith.constant 0 : index
    %c0_2 = arith.constant 0 : index
    %1 = vector.load %arg2[%c0_1, %c0_2] : memref<8x32xf32, #tpu.memory_space<vmem>>, vector<8x32xf32>
    %2 = tpu.concatenate %1, %1 in 1 : vector<8x32xf32>, vector<8x32xf32> -> vector<8x64xf32>
    %3 = arith.addf %0, %2 : vector<8x64xf32>
    %c0_3 = arith.constant 0 : index
    %c0_4 = arith.constant 0 : index
    %4 = vector.load %arg3[%c0_3, %c0_4] : memref<8x64xf32, #tpu.memory_space<vmem>>, vector<8x64xf32>
    tpu.vector_store %arg3[%c0_3, %c0_4], %3 {strides = array<i32>} : memref<8x64xf32, #tpu.memory_space<vmem>>, vector<8x64xf32>,
    return
  }
  func.func @transform_0(%arg0: i32) -> (i32, i32) {
    %c0_i32 = arith.constant 0 : i32
    %c0_i32_0 = arith.constant 0 : i32
    return %arg0, %c0_i32 : i32, i32
  }
  func.func @transform_1(%arg0: i32) -> (i32, i32) {
    %c0_i32 = arith.constant 0 : i32
    %c0_i32_0 = arith.constant 0 : i32
    return %arg0, %c0_i32 : i32, i32
  }
  func.func @transform_2(%arg0: i32) -> (i32, i32) {
    %c0_i32 = arith.constant 0 : i32
    %c0_i32_0 = arith.constant 0 : i32
    return %arg0, %c0_i32 : i32, i32
  }
}

</mosaic_0001>

<bundles_post_ra>
// kernel: tpu_custom_call.1
= control target key start
LH: loop header
LB: loop body
LE: loop exit
PB: predicated region body
PF: predicated region fallthrough
CT: control target
= control target key end

     0   :  { %7 = vsyncpa [#allocation3], 0  ;;  %s161_s0 = inlined_call_operand.hbm [shape: f32[8,64], index: 0, kind: input, shape index: {}]   ;;  %s162_s1 = inlined_call_operand.hbm [shape: f32[8,32], index: 1, kind: input, shape index: {}]   ;;  %s163_s2 = inlined_call_operand.hbm [shape: f32[8,64], index: 2, kind: output, shape index: {}]  }
   0x1   :  { %8 = vsyncpa [#allocation6], 0 }
   0x2   :  { %9 = vsyncpa [#allocation4], 0  ;;  %s133_s9 = smov [#allocation2]   ;;  %s134_s11 = smov [#allocation5]  }
   0x3   :  { %s16_s10 = sshll.u32 %s133_s9, 4  ;;  %s26_s12 = sshll.u32 %s134_s11, 4  ;;  %s17_s10 = int_to_ptr.vmem [resolvable:$true] %s16_s10  ;;  %s27_s12 = int_to_ptr.vmem [resolvable:$true] %s26_s12 }
   0x4   :  { %s75_s13 = scalar_lea.vmem %s17_s10, 128  ;;  %p80_p1 = scmp.lt.s32.totalorder %s17_s10, %s17_s10 }
   0x5   :  { %p76_p0 = scmp.ne.s32.totalorder %s17_s10, %s75_s13  ;;  %p81_p2 = scmp.lt.s32.totalorder %s75_s13, %s75_s13 }
   0x7   :  { %p82_p3 = por %p81_p2, %p80_p1 }
   0x9   :  { %p83_p4 = pnand %p82_p3, %p76_p0 }
   0xb   :  { %86 = shalt.err (!%p83_p4)
}
   0xc   :  { %19 = dma.hbm_to_vmem [thread:$0]  %s161_s0, 128, %s17_s10, [#allocation3]  }
   0xd   :  { %s95_s16 = scalar_lea.vmem %s27_s12, 128  ;;  %p100_p6 = scmp.lt.s32.totalorder %s27_s12, %s27_s12 }
   0xe   :  { %p96_p5 = scmp.ne.s32.totalorder %s27_s12, %s95_s16  ;;  %p101_p7 = scmp.lt.s32.totalorder %s95_s16, %s95_s16 }
  0x10   :  { %p102_p8 = por %p101_p7, %p100_p6 }
  0x12   :  { %p103_p9 = pnand %p102_p8, %p96_p5 }
  0x14   :  { %106 = shalt.err (!%p103_p9)
}
  0x15   :  { %29 = dma.hbm_to_vmem [thread:$0]  %s162_s1, 128, %s27_s12, [#allocation6]  }
  0x16   :  { %127 = dma.done.wait [#allocation3], 128  }
  0x17   :  { %128 = vsyncadd [#allocation3], 4294967168 }
  0x18   :  { %129 = dma.done.wait [#allocation6], 128  }
  0x19   :  { %130 = vsyncadd [#allocation6], 4294967168  ;;  %v37_v0 = vld [vmem:[#allocation5] sm:$0xff]  ;;  %s135_s19 = smov 32   ;;  %vm42_vm0 = vcmask 261120   ;;  %v36_v1 = vld [vmem:[#allocation2] sm:$0xff] }
  0x1a   :  { %39 = vrot.lane.b32.xlu0 %v37_v0, %s135_s19  ;;  %s136_s0 = smov [#allocation7]   ;;  %vm45_vm1 = vcmask 523264  }
  0x1b   :  { %s53_s20 = sshll.u32 %s136_s0, 4  ;;  %s54_s20 = int_to_ptr.vmem [resolvable:$true] %s53_s20 }
  0x1c   :  { %s107_s21 = scalar_lea.vmem %s54_s20, 128  ;;  %p112_p11 = scmp.lt.s32.totalorder %s54_s20, %s54_s20 }
  0x1d   :  { %p108_p10 = scmp.ne.s32.totalorder %s54_s20, %s107_s21  ;;  %p113_p12 = scmp.lt.s32.totalorder %s107_s21, %s107_s21 }
  0x1f   :  { %p114_p13 = por %p113_p12, %p112_p11 }
  0x21   :  { %p115_p0 = pnand %p114_p13, %p108_p10 }
  0x8c   :  { %v40_v2 = vpop.permute.xlu0 %39 }
  0x8d   :  { %v43_v3 = vsel %vm42_vm0, %v37_v0, %v40_v2 }
  0x8e   :  { %v44_v4 = vadd.f32 %v43_v3, %v36_v1 }
  0x90   :  { %46 = vst.msk [vmem:[#allocation7] sm:$0xff] %vm45_vm1, %v44_v4 }
  0x91   :  { %118 = shalt.err (!%p115_p0)
}
  0x92   :  { %56 = dma.vmem_to_hbm [thread:$0]  %s54_s20, 128, %s163_s2, [#allocation4]  }
  0x93   :  { %131 = dma.done.wait [#allocation4], 128  }
  0x94   :  { %132 = vsyncadd [#allocation4], 4294967168 }
  0x95   :  { %60 = vsyncpa [#allocation3], 1 }
  0x96   :  { %61 = vsyncpa [#allocation6], 1 }
  0x97   :  { %62 = vsyncpa [#allocation4], 1 }

</bundles_post_ra>
